<compile_context>
chip_gen: v7x
topology: tpu7x:2x2x1
jax: 0.10.0
libtpu: 0.0.40
codegen_flags: <defaults>
</compile_context>

<pallas_src>
import functools
import math

import jax
import jax.numpy as jnp
import numpy as np
from jax.experimental import pallas as pl
from jax.experimental.pallas import tpu as pltpu


def _round_up(x, m):
    return ((x + m - 1) // m) * m


# ----------------------------------------------------------------------------
# Pallas kernel: for sample b, p-tile i and rotation step jp (q-tile
# j = (i + jp) % nt) accumulate
#   factor * sum_{p in tile_i, q in tile_j} exp(-0.5*||f_p - f_q||^2)
#            * sum_k ( gate_p*S[p,k]*S[q,k] + S[p,k]*gate_q*S[q,k] )
# where factor = 0.5 for the diagonal (jp==0) and, for even nt, the antipodal
# pair (jp==nt/2, visited from both ends).  Summed over all visited pairs this
# equals sum_{p,q} W[p,q] * M[p,q] * gate_p exactly (W, M symmetric).
#
# Both contractions run on the MXU; exp runs on the EUP; only the d2 assembly,
# the W*M product and the final reduce touch the VPU/XLU.
# ----------------------------------------------------------------------------
def _dense_energy_kernel(featp_ref, featq_ref, segp_ref, segq_ref,
                         out_ref, acc_ref, *, nt):
    jp = pl.program_id(2)
    njp = pl.num_programs(2)

    fp = featp_ref[0]            # (T, F)   p-tile features (pixels on sublanes)
    fq = featq_ref[0]            # (F, T)   q-tile features (pixels on lanes)
    sp = segp_ref[0]             # (T, 2K)  [gate*seg | seg]   (p side)
    sq = segq_ref[0]             # (2K, T)  [seg ; gate*seg]   (q side)

    # Pairwise squared feature distance via the MXU:
    #   d2[p,q] = ||f_p||^2 + ||f_q||^2 - 2 f_p . f_q   (clamped >= 0 against
    #   cancellation so exp(-0.5*d2) <= 1).
    np2 = jnp.sum(fp * fp, axis=1, keepdims=True)                  # (T, 1)
    nq2 = jnp.sum(fq * fq, axis=0, keepdims=True)                  # (1, T)
    cross = jnp.dot(fp, fq, preferred_element_type=jnp.float32)    # (T, T)
    d2 = jnp.maximum(np2 + nq2 - 2.0 * cross, 0.0)
    w = jnp.exp(-0.5 * d2)

    # Symmetrized gated segmentation cross term via the MXU:
    #   m[p,q] = sum_k gate_p*S[p,k]*S[q,k] + S[p,k]*gate_q*S[q,k]
    m = jnp.dot(sp, sq, preferred_element_type=jnp.float32)        # (T, T)

    # Diagonal / antipodal tile pairs carry weight 0.5.
    half = jp == 0
    if nt % 2 == 0:
        half = jnp.logical_or(half, jp == nt // 2)
    factor = jnp.where(half, 0.5, 1.0)

    psum = jnp.sum(w * m, axis=(0, 1), keepdims=True)              # (1, 1)

    @pl.when(jp == 0)
    def _():
        acc_ref[...] = jnp.zeros_like(acc_ref)

    acc_ref[...] = acc_ref[...] + factor * psum

    @pl.when(jp == njp - 1)
    def _():
        out_ref[...] = acc_ref[...][None, None]


def _dense_energy_pallas(feat_col, feat_row, seg2_col, seg2_row, tile):
    n, hw_pad, fdim = feat_col.shape
    k2 = seg2_col.shape[-1]
    nt = hw_pad // tile
    njp = nt // 2 + 1            # upper-triangular (circular) pair enumeration
    grid = (n, nt, njp)

    def p_block(b, i, jp):
        return (b, i, 0)

    def q_block(b, i, jp):
        return (b, 0, (i + jp) % nt)

    cp_kwargs = dict(dimension_semantics=("parallel", "parallel", "arbitrary"))
    if tile >= 512:
        # Large (tile, tile) f32 temporaries: raise the scoped-VMEM limit.
        # 64 MiB is <= physical VMEM on v5e/v6e (128 MiB) and v7x (64 MiB);
        # a 1024x1024 tile uses ~20 MiB of live temporaries + ~2 MiB of
        # double-buffered inputs.
        cp_kwargs["vmem_limit_bytes"] = 64 * 1024 * 1024

    out = pl.pallas_call(
        functools.partial(_dense_energy_kernel, nt=nt),
        out_shape=jax.ShapeDtypeStruct((n, nt, 1, 1), jnp.float32),
        grid=grid,
        in_specs=[
            pl.BlockSpec((1, tile, fdim), p_block),   # feat, p side
            pl.BlockSpec((1, fdim, tile), q_block),   # feat, q side
            pl.BlockSpec((1, tile, k2), p_block),     # [gate*seg | seg], p side
            pl.BlockSpec((1, k2, tile), q_block),     # [seg ; gate*seg], q side
        ],
        out_specs=pl.BlockSpec((1, 1, 1, 1), lambda b, i, jp: (b, i, 0, 0)),
        scratch_shapes=[pltpu.VMEM((1, 1), jnp.float32)],
        compiler_params=pltpu.CompilerParams(**cp_kwargs),
    )(feat_col, feat_row, seg2_col, seg2_row)
    return jnp.sum(out[:, :, 0, 0], axis=1)          # (n,) per-sample energy


# ----------------------------------------------------------------------------
# Plain-JAX glue: F.interpolate resizes, gate / mask / feature construction.
# ----------------------------------------------------------------------------
def _nearest_resize_nchw(x, out_h, out_w):
    # F.interpolate(mode='nearest'): src = floor(dst * in/out)
    _, _, in_h, in_w = x.shape
    ys = jnp.minimum(jnp.arange(out_h, dtype=jnp.int32) * in_h // out_h, in_h - 1)
    xs = jnp.minimum(jnp.arange(out_w, dtype=jnp.int32) * in_w // out_w, in_w - 1)
    return x[:, :, ys, :][:, :, :, xs]


def _bilinear_resize_nchw(x, out_h, out_w):
    # F.interpolate(mode='bilinear', align_corners=False), no antialias.
    _, _, in_h, in_w = x.shape

    def coords(out_size, in_size):
        d = jnp.arange(out_size, dtype=jnp.float32)
        src = jnp.maximum((d + 0.5) * (in_size / out_size) - 0.5, 0.0)
        i0 = jnp.minimum(jnp.floor(src).astype(jnp.int32), in_size - 1)
        i1 = jnp.minimum(i0 + 1, in_size - 1)
        w1 = src - i0.astype(jnp.float32)
        return i0, i1, w1

    y0, y1, wy = coords(out_h, in_h)
    x0, x1, wx = coords(out_w, in_w)
    rows = (x[:, :, y0, :] * (1.0 - wy)[None, None, :, None]
            + x[:, :, y1, :] * wy[None, None, :, None])
    return (rows[:, :, :, x0] * (1.0 - wx)[None, None, None, :]
            + rows[:, :, :, x1] * wx[None, None, None, :])


def _prepare(images, segmentations, rois, seg_label,
             sigma_rgb, sigma_xy, scale_factor):
    n, k, h, w = segmentations.shape
    hs = int(math.floor(h * scale_factor))
    ws = int(math.floor(w * scale_factor))

    # TODO(synk): the F.interpolate resizes (data-dependent gathers) stay in
    # plain JAX glue; only O(HW) bytes, negligible next to the O(HW^2) kernel.
    img_s = _nearest_resize_nchw(images.astype(jnp.float32), hs, ws)
    seg_s = _bilinear_resize_nchw(segmentations.astype(jnp.float32), hs, ws)
    roi_s = _nearest_resize_nchw(rois.astype(jnp.float32)[:, None], hs, ws)[:, 0]
    lab_s = _nearest_resize_nchw(seg_label.astype(jnp.float32), hs, ws)
    unlabel = (lab_s.astype(jnp.int32) == 255)[:, 0]          # (n, hs, ws)

    sigma_xy_s = sigma_xy * scale_factor

    gate = roi_s - jnp.max(seg_s, axis=1)
    gate = jnp.where(unlabel, 1.0, gate)
    gate = jnp.maximum(gate, 0.0)                             # (n, hs, ws)
    seg_m = seg_s * roi_s[:, None]                            # (n, k, hs, ws)

    c = img_s.shape[1]
    yy = jnp.broadcast_to(jnp.arange(hs, dtype=jnp.float32)[:, None], (hs, ws))
    xx = jnp.broadcast_to(jnp.arange(ws, dtype=jnp.float32)[None, :], (hs, ws))
    coords = jnp.stack([yy, xx], axis=0) / sigma_xy_s          # (2, hs, ws)
    feat = jnp.concatenate(
        [jnp.broadcast_to(coords[None], (n, 2, hs, ws)), img_s / sigma_rgb],
        axis=1)                                                # (n, 2+c, hs, ws)

    hw = hs * ws
    return (feat.reshape(n, 2 + c, hw),
            seg_m.reshape(n, k, hw),
            gate.reshape(n, hw))


def dense_energy_loss_forward(images, segmentations, rois, seg_label, *,
                              weight, sigma_rgb, sigma_xy, scale_factor,
                              tile=1024):
    """Forward of DenseEnergyLoss; returns a shape-(1,) float32 loss."""
    n = segmentations.shape[0]
    feat_f, seg_f, gate_f = _prepare(images, segmentations, rois, seg_label,
                                     sigma_rgb, sigma_xy, scale_factor)
    hw = feat_f.shape[-1]

    # Square pixel tiles: the symmetric tile-pair enumeration needs the same
    # partition on both sides.  tile=1024 keeps the per-step footprint inside
    # v7x's 64 MiB physical VMEM; v5e/v6e (128 MiB) have extra headroom.
    tile = max(128, (int(tile) // 128) * 128)
    tile = min(tile, _round_up(hw, 128))
    hw_pad = _round_up(hw, tile)
    pad = hw_pad - hw

    # Pad the feature channel axis to a multiple of 8 (sublane / MXU
    # contraction alignment); zero channels change nothing.
    fdim = _round_up(feat_f.shape[1], 8)
    feat_f = jnp.pad(feat_f, ((0, 0), (0, fdim - feat_f.shape[1]), (0, pad)))

    # Fold the gate into the segmentation; keep gated + ungated copies so a
    # single MXU contraction yields the symmetrized cross term
    #   sum_k gate_p*S_pk*S_qk + S_pk*gate_q*S_qk.
    # Padded pixels carry seg = 0 (both copies), so they contribute nothing.
    seg_g = seg_f * gate_f[:, None, :]
    seg_f = jnp.pad(seg_f, ((0, 0), (0, 0), (0, pad)))
    seg_g = jnp.pad(seg_g, ((0, 0), (0, 0), (0, pad)))

    # Dual layouts so the kernel needs no in-kernel transposes:
    #   p-side: pixels on sublanes, q-side: pixels on lanes.
    feat_col = jnp.transpose(feat_f, (0, 2, 1))                  # (n, hw_pad, F)
    feat_row = feat_f                                            # (n, F, hw_pad)
    seg2_col = jnp.transpose(
        jnp.concatenate([seg_g, seg_f], axis=1), (0, 2, 1))      # (n, hw_pad, 2K)
    seg2_row = jnp.concatenate([seg_f, seg_g], axis=1)           # (n, 2K, hw_pad)

    per_sample = _dense_energy_pallas(feat_col, feat_row,
                                      seg2_col, seg2_row, tile)  # (n,)
    loss = -jnp.sum(per_sample) / n
    return (weight * loss).reshape(1)


# ----------------------------------------------------------------------------
# Pure-JAX reference (exact dense Gaussian) for correctness checking.
# ----------------------------------------------------------------------------
def _dense_energy_loss_ref(images, segmentations, rois, seg_label, *,
                           weight, sigma_rgb, sigma_xy, scale_factor):
    n = segmentations.shape[0]
    feat_f, seg_f, gate_f = _prepare(images, segmentations, rois, seg_label,
                                     sigma_rgb, sigma_xy, scale_factor)
    total = jnp.float32(0.0)
    for b in range(n):
        f = feat_f[b]                                                # (F, HW)
        d2 = jnp.sum((f[:, :, None] - f[:, None, :]) ** 2, axis=0)   # (HW, HW)
        wmat = jnp.exp(-0.5 * d2)
        s = seg_f[b]                                                 # (K, HW)
        m = jnp.sum(s[:, :, None] * s[:, None, :], axis=0)           # (HW, HW)
        total = total + jnp.sum(wmat * m * gate_f[b][:, None])
    return (weight * (-total / n)).reshape(1)


if __name__ == "__main__":
    key = jax.random.PRNGKey(0)
    k_img, k_seg, k_roi, k_lab, k_unl = jax.random.split(key, 5)

    n, c, k, h, w = 2, 3, 4, 32, 32
    weight, sigma_rgb, sigma_xy = 1e-7, 15.0, 80.0

    images = jax.random.uniform(k_img, (n, c, h, w), jnp.float32) * 60.0
    segmentations = jax.nn.softmax(
        jax.random.normal(k_seg, (n, k, h, w), jnp.float32), axis=1)
    rois = (jax.random.uniform(k_roi, (n, h, w), jnp.float32) > 0.1).astype(jnp.float32)
    labels = jax.random.randint(k_lab, (n, 1, h, w), 0, k).astype(jnp.float32)
    labels = jnp.where(jax.random.uniform(k_unl, (n, 1, h, w)) < 0.3, 255.0, labels)

    # Config 1: scale 0.5 -> 16x16 grid (HW=256), tile=128 -> nt=2 (even nt:
    # exercises the diagonal and antipodal 0.5-weighted tile pairs).
    # Config 2: scale 0.75 -> 24x24 grid (HW=576, padded to 640), tile=128 ->
    # nt=5 (odd nt, plus zero-padded tail pixels).
    for scale_factor in (0.5, 0.75):
        loss = dense_energy_loss_forward(
            images, segmentations, rois, labels,
            weight=weight, sigma_rgb=sigma_rgb, sigma_xy=sigma_xy,
            scale_factor=scale_factor, tile=128)
        loss = jax.block_until_ready(loss)

        ref = jax.block_until_ready(_dense_energy_loss_ref(
            images, segmentations, rois, labels,
            weight=weight, sigma_rgb=sigma_rgb, sigma_xy=sigma_xy,
            scale_factor=scale_factor))

        np.testing.assert_allclose(np.asarray(loss), np.asarray(ref),
                                   rtol=5e-3, atol=1e-12)
    print("KERNEL_OK")
</pallas_src>

<mosaic_0001>
module attributes {stable_mosaic.version = 11 : i64} {
  func.func @_dense_energy_kernel(%arg0: i32, %arg1: i32, %arg2: i32, %arg3: memref<1x128x8xf32, #tpu.memory_space<vmem>>, %arg4: memref<1x8x128xf32, #tpu.memory_space<vmem>>, %arg5: memref<1x128x8xf32, #tpu.memory_space<vmem>>, %arg6: memref<1x8x128xf32, #tpu.memory_space<vmem>>, %arg7: memref<1x1x1x1xf32, #tpu.memory_space<vmem>>, %arg8: memref<1x1xf32, #tpu.memory_space<vmem>>) attributes {dimension_semantics = [#tpu.dimension_semantics<parallel>, #tpu.dimension_semantics<parallel>, #tpu.dimension_semantics<arbitrary>], iteration_bounds = array<i64: 2, 2, 2>, scalar_prefetch = 0 : i64, scratch_operands = 1 : i64, tpu.core_type = #tpu.core_type<tc>, window_params = [{transform_indices = @transform_0, window_bounds = array<i64: 1, 128, 8>}, {transform_indices = @transform_1, window_bounds = array<i64: 1, 8, 128>}, {transform_indices = @transform_2, window_bounds = array<i64: 1, 128, 8>}, {transform_indices = @transform_3, window_bounds = array<i64: 1, 8, 128>}, {transform_indices = @transform_4, window_bounds = array<i64: 1, 1, 1, 1>}]} {
    %c0 = arith.constant 0 : index
    %c0_0 = arith.constant 0 : index
    %c0_1 = arith.constant 0 : index
    %0 = vector.load %arg3[%c0, %c0_0, %c0_1] : memref<1x128x8xf32, #tpu.memory_space<vmem>>, vector<1x128x8xf32>
    %1 = vector.shape_cast %0 : vector<1x128x8xf32> to vector<128x8xf32>
    %c0_2 = arith.constant 0 : index
    %c0_3 = arith.constant 0 : index
    %c0_4 = arith.constant 0 : index
    %2 = vector.load %arg4[%c0_2, %c0_3, %c0_4] : memref<1x8x128xf32, #tpu.memory_space<vmem>>, vector<1x8x128xf32>
    %3 = vector.shape_cast %2 : vector<1x8x128xf32> to vector<8x128xf32>
    %c0_5 = arith.constant 0 : index
    %c0_6 = arith.constant 0 : index
    %c0_7 = arith.constant 0 : index
    %4 = vector.load %arg5[%c0_5, %c0_6, %c0_7] : memref<1x128x8xf32, #tpu.memory_space<vmem>>, vector<1x128x8xf32>
    %5 = vector.shape_cast %4 : vector<1x128x8xf32> to vector<128x8xf32>
    %c0_8 = arith.constant 0 : index
    %c0_9 = arith.constant 0 : index
    %c0_10 = arith.constant 0 : index
    %6 = vector.load %arg6[%c0_8, %c0_9, %c0_10] : memref<1x8x128xf32, #tpu.memory_space<vmem>>, vector<1x8x128xf32>
    %7 = vector.shape_cast %6 : vector<1x8x128xf32> to vector<8x128xf32>
    %8 = arith.mulf %1, %1 : vector<128x8xf32>
    %cst = arith.constant dense<0.000000e+00> : vector<128xf32>
    %9 = vector.multi_reduction <add>, %8, %cst [1] : vector<128x8xf32> to vector<128xf32>
    %10 = vector.shape_cast %9 : vector<128xf32> to vector<128x1xf32>
    %11 = arith.mulf %3, %3 : vector<8x128xf32>
    %cst_11 = arith.constant dense<0.000000e+00> : vector<128xf32>
    %12 = vector.multi_reduction <add>, %11, %cst_11 [0] : vector<8x128xf32> to vector<128xf32>
    %13 = vector.shape_cast %12 : vector<128xf32> to vector<1x128xf32>
    %cst_12 = arith.constant dense<0.000000e+00> : vector<128x128xf32>
    %14 = tpu.matmul %1, %3, %cst_12 {dimension_numbers = #tpu.dot_dimension_numbers<[1], [0], [0], [1], [0, 0, 1, 1], [], []>} : vector<128x8xf32>, vector<8x128xf32>, vector<128x128xf32> -> vector<128x128xf32>
    %15 = vector.broadcast %10 : vector<128x1xf32> to vector<128x128xf32>
    %16 = vector.broadcast %13 : vector<1x128xf32> to vector<128x128xf32>
    %17 = arith.addf %15, %16 : vector<128x128xf32>
    %cst_13 = arith.constant 2.000000e+00 : f32
    %18 = vector.broadcast %cst_13 : f32 to vector<128x128xf32>
    %19 = arith.mulf %18, %14 : vector<128x128xf32>
    %20 = arith.subf %17, %19 : vector<128x128xf32>
    %cst_14 = arith.constant 0.000000e+00 : f32
    %21 = vector.broadcast %cst_14 : f32 to vector<128x128xf32>
    %22 = arith.maximumf %20, %21 : vector<128x128xf32>
    %cst_15 = arith.constant -5.000000e-01 : f32
    %23 = vector.broadcast %cst_15 : f32 to vector<128x128xf32>
    %24 = arith.mulf %23, %22 : vector<128x128xf32>
    %25 = math.exp %24 : vector<128x128xf32>
    %cst_16 = arith.constant dense<0.000000e+00> : vector<128x128xf32>
    %26 = tpu.matmul %5, %7, %cst_16 {dimension_numbers = #tpu.dot_dimension_numbers<[1], [0], [0], [1], [0, 0, 1, 1], [], []>} : vector<128x8xf32>, vector<8x128xf32>, vector<128x128xf32> -> vector<128x128xf32>
    %c0_i32 = arith.constant 0 : i32
    %27 = arith.cmpi eq, %arg2, %c0_i32 : i32
    %c1_i32 = arith.constant 1 : i32
    %28 = arith.cmpi eq, %arg2, %c1_i32 : i32
    %29 = arith.ori %27, %28 : i1
    %cst_17 = arith.constant 5.000000e-01 : f32
    %cst_18 = arith.constant 1.000000e+00 : f32
    %30 = arith.select %29, %cst_17, %cst_18 : f32
    %31 = arith.mulf %25, %26 : vector<128x128xf32>
    %32 = vector.shape_cast %31 : vector<128x128xf32> to vector<1x128x128xf32>
    %cst_19 = arith.constant dense<0.000000e+00> : vector<1xf32>
    %33 = vector.multi_reduction <add>, %32, %cst_19 [1, 2] : vector<1x128x128xf32> to vector<1xf32>
    %34 = vector.shape_cast %33 : vector<1xf32> to vector<1x1x1xf32>
    %35 = vector.extract %34[0, 0, 0] : f32 from vector<1x1x1xf32>
    %36 = vector.broadcast %35 : f32 to vector<1x1xf32>
    %c0_i32_20 = arith.constant 0 : i32
    %37 = arith.cmpi eq, %arg2, %c0_i32_20 : i32
    %38 = arith.extui %37 : i1 to i32
    %c0_i32_21 = arith.constant 0 : i32
    %39 = arith.cmpi ne, %38, %c0_i32_21 : i32
    scf.if %39 {
      %cst_28 = arith.constant 0.000000e+00 : f32
      %48 = vector.broadcast %cst_28 : f32 to vector<1x1xf32>
      %c0_29 = arith.constant 0 : index
      %c0_30 = arith.constant 0 : index
      %49 = vector.load %arg8[%c0_29, %c0_30] : memref<1x1xf32, #tpu.memory_space<vmem>>, vector<1x1xf32>
      tpu.vector_store %arg8[%c0_29, %c0_30], %48 {strides = array<i32>} : memref<1x1xf32, #tpu.memory_space<vmem>>, vector<1x1xf32>,
    } else {
    }
    %c0_22 = arith.constant 0 : index
    %c0_23 = arith.constant 0 : index
    %40 = vector.load %arg8[%c0_22, %c0_23] : memref<1x1xf32, #tpu.memory_space<vmem>>, vector<1x1xf32>
    %41 = vector.broadcast %30 : f32 to vector<1x1xf32>
    %42 = arith.mulf %41, %36 : vector<1x1xf32>
    %43 = arith.addf %40, %42 : vector<1x1xf32>
    %c0_24 = arith.constant 0 : index
    %c0_25 = arith.constant 0 : index
    %44 = vector.load %arg8[%c0_24, %c0_25] : memref<1x1xf32, #tpu.memory_space<vmem>>, vector<1x1xf32>
    tpu.vector_store %arg8[%c0_24, %c0_25], %43 {strides = array<i32>} : memref<1x1xf32, #tpu.memory_space<vmem>>, vector<1x1xf32>,
    %c1_i32_26 = arith.constant 1 : i32
    %45 = arith.cmpi eq, %arg2, %c1_i32_26 : i32
    %46 = arith.extui %45 : i1 to i32
    %c0_i32_27 = arith.constant 0 : i32
    %47 = arith.cmpi ne, %46, %c0_i32_27 : i32
    scf.if %47 {
      %c0_28 = arith.constant 0 : index
      %c0_29 = arith.constant 0 : index
      %48 = vector.load %arg8[%c0_28, %c0_29] : memref<1x1xf32, #tpu.memory_space<vmem>>, vector<1x1xf32>
      %49 = vector.shape_cast %48 : vector<1x1xf32> to vector<1x1x1x1xf32>
      %c0_30 = arith.constant 0 : index
      %c0_31 = arith.constant 0 : index
      %c0_32 = arith.constant 0 : index
      %c0_33 = arith.constant 0 : index
      %50 = vector.load %arg7[%c0_30, %c0_31, %c0_32, %c0_33] : memref<1x1x1x1xf32, #tpu.memory_space<vmem>>, vector<1x1x1x1xf32>
      tpu.vector_store %arg7[%c0_30, %c0_31, %c0_32, %c0_33], %49 {strides = array<i32>} : memref<1x1x1x1xf32, #tpu.memory_space<vmem>>, vector<1x1x1x1xf32>,
    } else {
    }
    return
  }
  func.func @transform_0(%arg0: i32, %arg1: i32, %arg2: i32) -> (i32, i32, i32) {
    %c0_i32 = arith.constant 0 : i32
    %c0_i32_0 = arith.constant 0 : i32
    return %arg0, %arg1, %c0_i32 : i32, i32, i32
  }
  func.func @transform_1(%arg0: i32, %arg1: i32, %arg2: i32) -> (i32, i32, i32) {
    %0 = arith.addi %arg1, %arg2 : i32
    %c2_i32 = arith.constant 2 : i32
    %c0_i32 = arith.constant 0 : i32
    %1 = arith.cmpi eq, %c2_i32, %c0_i32 : i32
    %c1_i32 = arith.constant 1 : i32
    %2 = arith.select %1, %c1_i32, %c2_i32 : i32
    %3 = arith.remsi %0, %2 : i32
    %c0_i32_0 = arith.constant 0 : i32
    %4 = arith.cmpi ne, %3, %c0_i32_0 : i32
    %c0_i32_1 = arith.constant 0 : i32
    %5 = arith.cmpi slt, %3, %c0_i32_1 : i32
    %c0_i32_2 = arith.constant 0 : i32
    %6 = arith.cmpi slt, %2, %c0_i32_2 : i32
    %7 = arith.xori %5, %6 : i1
    %8 = arith.andi %7, %4 : i1
    %9 = arith.addi %3, %2 : i32
    %10 = arith.select %8, %9, %3 : i32
    %c0_i32_3 = arith.constant 0 : i32
    %c0_i32_4 = arith.constant 0 : i32
    return %arg0, %c0_i32_3, %10 : i32, i32, i32
  }
  func.func @transform_2(%arg0: i32, %arg1: i32, %arg2: i32) -> (i32, i32, i32) {
    %c0_i32 = arith.constant 0 : i32
    %c0_i32_0 = arith.constant 0 : i32
    return %arg0, %arg1, %c0_i32 : i32, i32, i32
  }
  func.func @transform_3(%arg0: i32, %arg1: i32, %arg2: i32) -> (i32, i32, i32) {
    %0 = arith.addi %arg1, %arg2 : i32
    %c2_i32 = arith.constant 2 : i32
    %c0_i32 = arith.constant 0 : i32
    %1 = arith.cmpi eq, %c2_i32, %c0_i32 : i32
    %c1_i32 = arith.constant 1 : i32
    %2 = arith.select %1, %c1_i32, %c2_i32 : i32
    %3 = arith.remsi %0, %2 : i32
    %c0_i32_0 = arith.constant 0 : i32
    %4 = arith.cmpi ne, %3, %c0_i32_0 : i32
    %c0_i32_1 = arith.constant 0 : i32
    %5 = arith.cmpi slt, %3, %c0_i32_1 : i32
    %c0_i32_2 = arith.constant 0 : i32
    %6 = arith.cmpi slt, %2, %c0_i32_2 : i32
    %7 = arith.xori %5, %6 : i1
    %8 = arith.andi %7, %4 : i1
    %9 = arith.addi %3, %2 : i32
    %10 = arith.select %8, %9, %3 : i32
    %c0_i32_3 = arith.constant 0 : i32
    %c0_i32_4 = arith.constant 0 : i32
    return %arg0, %c0_i32_3, %10 : i32, i32, i32
  }
  func.func @transform_4(%arg0: i32, %arg1: i32, %arg2: i32) -> (i32, i32, i32, i32) {
    %c0_i32 = arith.constant 0 : i32
    %c0_i32_0 = arith.constant 0 : i32
    %c0_i32_1 = arith.constant 0 : i32
    return %arg0, %arg1, %c0_i32, %c0_i32_0 : i32, i32, i32, i32
  }
}

</mosaic_0001>

<bundles_post_ra>
// kernel: tpu_custom_call.1
= control target key start
LH: loop header
LB: loop body
LE: loop exit
PB: predicated region body
PF: predicated region fallthrough
CT: control target
= control target key end

     0   :  { %s1653_s15 = smov 0   ;;  %s1655_s16 = smov 0   ;;  %s1937_s0 = inlined_call_operand.vmem [shape: f32[2,256,8], index: 0, kind: input, shape index: {}]   ;;  %s1938_s1 = inlined_call_operand.vmem [shape: f32[2,8,256], index: 1, kind: input, shape index: {}]   ;;  %s1939_s2 = inlined_call_operand.vmem [shape: f32[2,256,8], index: 2, kind: input, shape index: {}]   ;;  %s1940_s3 = inlined_call_operand.vmem [shape: f32[2,8,256], index: 3, kind: input, shape index: {}]   ;;  %s1941_s4 = inlined_call_operand.vmem [shape: f32[2,2,1,1], index: 4, kind: output, shape index: {}]  }
   0x1   :  { %s1657_s17 = smov 0   ;;  %s1659_s18 = smov 0  }
   0x2   :  { %s1661_s19 = smov 0   ;;  %s1663_s20 = smov 0  }
   0x3   :  { %s1665_s21 = smov 0  }
   0x4 LB: > { %s26_s22 = sadd.s32 1, %s1613_s18  ;;  %s29_s23 = sadd.s32 1, %s1617_s19  ;;  %s1625_s21 = sphi %s1665_s21, %s14_s21   ;;  %s1621_s20 = sphi %s1663_s20, %s1948_s20   ;;  %s1617_s19 = sphi %s1661_s19, %s1947_s19   ;;  %s1613_s18 = sphi %s1659_s18, %s1946_s18   ;;  %s1609_s17 = sphi %s1657_s17, %s1945_s17   ;;  %s1605_s16 = sphi %s1655_s16, %s1944_s16   ;;  %s1601_s15 = sphi %s1653_s15, %s1943_s15  }
   0x5   : > { %p27_p0 = scmp.ge.s32.totalorder %s26_s22, 2  ;;  %p1340_p1 = scmp.ge.s32.totalorder %s1625_s21, 1 }
   0x6   : > { %p341_p2 = scmp.lt.s32.totalorder %s1625_s21, 9  ;;  %s33_s24 = sadd.s32 1, %s1621_s20 }
   0x7   : > { %s1950_s22 = smov (%p27_p0, %s26_s22), 0  ;;  %s1952_s23 = smov (!%p27_p0, %s29_s23), %s1617_s19 }
   0x8   : > { %p342_p3 = pnand %p1340_p1, %p341_p2  ;;  %p31_p4 = scmp.ge.s32.totalorder %s1952_s23, 2 }
   0x9   : > { %s1341_s25 = sshll.u32 (!%p342_p3), %s1605_s16, 4  ;;  %p425_p6 = scmp.lt.s32.totalorder (!%p342_p3), %s1609_s17, 1  ;;  %vm569_vm0 = vcmask (!%p342_p3), 64512  }
   0xa   : > { %s1954_s23 = smov (%p31_p4, %s1952_s23), 0  ;;  %s1956_s24 = smov (!%p31_p4, %s33_s24), %s1621_s20 }
   0xb   : > { %p35_p5 = scmp.ge.s32.totalorder %s1956_s24, 2  ;;  %345 = sbr.rel (%p342_p3) target bundleno = 522 (0x20a), region = 36 }
   0xc   : > { %p427_p7 = scmp.lt.s32.totalorder (!%p342_p3), %s1341_s25, 31  ;;  %s434_s26 = sadd.s32 (!%p342_p3), %s1601_s15, %s1605_s16 }
   0xd   : > { %s1958_s24 = smov (%p35_p5, %s1956_s24), 0  ;;  %p435_p8 = scmp.lt.s32.totalorder (!%p342_p3), %s434_s26, 0 }
   0xe   : > { %s436_s29 = ssub.s32 (!%p342_p3), 0, %s434_s26  ;;  %p514_p9 = scmp.lt.s32.totalorder (!%p342_p3), %s1605_s16, 1 }
   0xf   : > { %s1344_s5 = smin.u32 (!%p342_p3), %s436_s29, %s434_s26  ;;  %p1123_p12 = scmp.eq.s32.totalorder (!%p342_p3), %s1601_s15, 0 }
  0x10   : > { %s438_s9 = sand.u32 (!%p342_p3), 1, %s1344_s5   ;;  %p1124_p13 = scmp.eq.s32.totalorder (!%p342_p3), %s1601_s15, 1 }
  0x11   : > { %s439_s10 = ssub.s32 (!%p342_p3), 0, %s438_s9  ;;  %p1390_p1 = scmp.ne.s32.totalorder (!%p342_p3), %s1601_s15, 0 }
  0x12   : > { %s1960_s17 = smov (!%p425_p6, %s1609_s17), 1  ;;  %s1962_s25 = smov (!%p427_p7, %s1341_s25), 31 }
  0x13   : > { %s1342_s27 = sshll.u32 %s1960_s17, 5  ;;  %s1347_s11 = sshll.u32 %s1960_s17, 1  ;;  %vm1171_vm1 = vcmask (!%p1390_p1), 0  }
  0x14   : > { %s430_s28 = sadd.s32 %s1342_s27, %s1962_s25  ;;  %s1964_s10 = smov (!%p435_p8, %s439_s10), %s438_s9 }
  0x15   : > { %s1343_s30 = sshll.u32 %s430_s28, 3  ;;  %p1346_p10 = scmp.lt.s32.totalorder %s1964_s10, 0 }
  0x16   : > { %s1708_s8 = scalar_lea.vmem %s1937_s0, %s1343_s30  ;;  %s1721_s14 = scalar_lea.vmem %s1939_s2, %s1343_s30 }
  0x17   : > { %v519_v0 = vld [vmem:[%s1708_s8] sm:$0xff]  ;;  %v520_v1 = vld [vmem:[%s1708_s8 + $0x8] sm:$0xff]  ;;  %v521_v2 = vld [vmem:[%s1708_s8 + $0x10] sm:$0xff]  ;;  %s445_s25 = sadd.s32 2, %s1964_s10  ;;  %s1966_s16 = smov (!%p514_p9, %s1605_s16), 1 }
  0x18   : > { %v553_v3 = vmul.f32 %v519_v0, %v519_v0  ;;  %1430 = vmatprep.mubr.msk.f32.mxu0 %vm569_vm0, %v519_v0  ;;  %v1716_v4 = vld [vmem:[%s1708_s8 + $0x18] sm:$0xff]  ;;  %v555_v5 = vmul.f32 %v521_v2, %v521_v2  ;;  %v554_v6 = vmul.f32 %v520_v1, %v520_v1  ;;  %v536_v8 = vld [vmem:[%s1721_s14] sm:$0xff]  ;;  %s1968_s25 = smov (!%p1346_p10, %s445_s25), %s1964_s10  ;;  %v1733_v12 = vld [vmem:[%s1708_s8 + $0x28] sm:$0xff]  ;;  %s1738_s26 = sadd.s32 %s1347_s11, %s1966_s16 }
  0x19   : > { %v556_v7 = vmul.f32 %v1716_v4, %v1716_v4  ;;  %v523_v10 = vld [vmem:[%s1708_s8 + $0x20] sm:$0xff]  ;;  %1456 = vmatprep.mubr.msk.f32.mxu1 %vm569_vm0, %v536_v8  ;;  %v558_v16 = vmul.f32 %v1733_v12, %v1733_v12  ;;  %p449_p11 = scmp.lt.s32.totalorder %s1968_s25, 1  ;;  %s518_s29 = scalar_lea.vmem %s1941_s4, %s1738_s26  ;;  %v525_v19 = vld [vmem:[%s1708_s8 + $0x30] sm:$0xff]  ;;  %v1753_v20 = vld [vmem:[%s1708_s8 + $0x38] sm:$0xff] }
  0x1a   : > { %v570_v9 = vsel %vm569_vm0, %v553_v3, 0.0  ;;  %v576_v11 = vsel %vm569_vm0, %v555_v5, 0.0  ;;  %v573_v13 = vsel %vm569_vm0, %v554_v6, 0.0  ;;  %v557_v14 = vmul.f32 %v523_v10, %v523_v10  ;;  %v537_v25 = vld [vmem:[%s1721_s14 + $0x8] sm:$0xff]  ;;  %v527_v26 = vld [vmem:[%s1708_s8 + $0x40] sm:$0xff]  ;;  %v538_v28 = vld [vmem:[%s1721_s14 + $0x10] sm:$0xff]  ;;  %p1903_p0 = por %p1124_p13, %p1123_p12 }
  0x1b   : > { %571 = vadd.xlane.f32.xlu0 %v570_v9  ;;  %577 = vadd.xlane.f32.xlu1 %v576_v11  ;;  %v579_v15 = vsel %vm569_vm0, %v556_v7, 0.0  ;;  %s1970_s25 = smov (!%p449_p11, %s1968_s25), 1  ;;  %v585_v18 = vsel %vm569_vm0, %v558_v16, 0.0  ;;  %v560_v21 = vmul.f32 %v1753_v20, %v1753_v20  ;;  %v559_v22 = vmul.f32 %v525_v19, %v525_v19  ;;  %v528_v27 = vld [vmem:[%s1708_s8 + $0x48] sm:$0xff]  ;;  %v539_v33 = vld [vmem:[%s1721_s14 + $0x18] sm:$0xff]  ;;  %v529_v34 = vld [vmem:[%s1708_s8 + $0x50] sm:$0xff] }
  0x1c   : > { %v582_v17 = vsel %vm569_vm0, %v557_v14, 0.0  ;;  %s452_s16 = sadd.s32 %s1347_s11, %s1970_s25  ;;  %v562_v31 = vmul.f32 %v528_v27, %v528_v27  ;;  %v561_v32 = vmul.f32 %v527_v26, %v527_v26  ;;  %v530_v35 = vld [vmem:[%s1708_s8 + $0x58] sm:$0xff]  ;;  %v540_v36 = vld [vmem:[%s1721_s14 + $0x20] sm:$0xff]  ;;  %v563_v40 = vmul.f32 %v529_v34, %v529_v34  ;;  %v541_v41 = vld [vmem:[%s1721_s14 + $0x28] sm:$0xff] }
  0x1d   : > { %s1348_s30 = sshll.u32 %s452_s16, 3  ;;  %v591_v29 = vsel %vm569_vm0, %v560_v21, 0.0  ;;  %v588_v30 = vsel %vm569_vm0, %v559_v22, 0.0  ;;  %v564_v39 = vmul.f32 %v530_v35, %v530_v35  ;;  %v531_v42 = vld [vmem:[%s1708_s8 + $0x60] sm:$0xff]  ;;  %v532_v43 = vld [vmem:[%s1708_s8 + $0x68] sm:$0xff]  ;;  %v542_v44 = vld [vmem:[%s1721_s14 + $0x30] sm:$0xff] }
  0x1e   : > { %s454_s7 = scalar_lea.vmem %s1938_s1, %s1348_s30  ;;  %s498_s17 = scalar_lea.vmem %s1940_s3, %s1348_s30  ;;  %v597_v37 = vsel %vm569_vm0, %v562_v31, 0.0  ;;  %v594_v38 = vsel %vm569_vm0, %v561_v32, 0.0  ;;  %v600_v46 = vsel %vm569_vm0, %v563_v40, 0.0  ;;  %v566_v47 = vmul.f32 %v532_v43, %v532_v43  ;;  %v543_v49 = vld [vmem:[%s1721_s14 + $0x38] sm:$0xff]  ;;  %v533_v50 = vld [vmem:[%s1708_s8 + $0x70] sm:$0xff]  ;;  %v544_v52 = vld [vmem:[%s1721_s14 + $0x40] sm:$0xff] }
  0x1f   : > { %574 = vadd.xlane.f32.xlu0 %v573_v13  ;;  %580 = vadd.xlane.f32.xlu1 %v579_v15  ;;  %v1763_v23 = vld [vmem:[%s454_s7] sm:$0xff]  ;;  %v603_v45 = vsel %vm569_vm0, %v564_v39, 0.0  ;;  %v565_v48 = vmul.f32 %v531_v42, %v531_v42  ;;  %v534_v51 = vld [vmem:[%s1708_s8 + $0x78] sm:$0xff]  ;;  %v567_v56 = vmul.f32 %v533_v50, %v533_v50  ;;  %v545_v57 = vld [vmem:[%s1721_s14 + $0x48] sm:$0xff]  ;;  %s1126_s11 = scalar_select %p1903_p0, 0.5, 1.0 }
  0x20   : > { %v552_v24 = vld [vmem:[%s498_s17] sm:$0xff]  ;;  %1428 = vmatprep.subr.mxu0 %v1763_v23  ;;  %v609_v53 = vsel %vm569_vm0, %v566_v47, 0.0  ;;  %v568_v55 = vmul.f32 %v534_v51, %v534_v51  ;;  %v546_v58 = vld [vmem:[%s1721_s14 + $0x50] sm:$0xff]  ;;  %v547_v61 = vld [vmem:[%s1721_s14 + $0x58] sm:$0xff] }
  0x21   : > { %1454 = vmatprep.subr.mxu1 %v552_v24  ;;  %1429 = vmatpush3.msra.mxu0 %v1763_v23  ;;  %v606_v54 = vsel %vm569_vm0, %v565_v48, 0.0  ;;  %v612_v60 = vsel %vm569_vm0, %v567_v56, 0.0  ;;  %v548_v62 = vld [vmem:[%s1721_s14 + $0x60] sm:$0xff]  ;;  %v549_v63 = vld [vmem:[%s1721_s14 + $0x68] sm:$0xff]  ;;  %v550_v0 = vld [vmem:[%s1721_s14 + $0x70] sm:$0xff] }
  0x22   : > { %1455 = vmatpush3.msra.mxu1 %v552_v24  ;;  %1431 = vmatmul.mubr.msk.f32.vlgmr.msra.gmra.mrb[0].mxu0 %vm569_vm0, %v520_v1  ;;  %v615_v59 = vsel %vm569_vm0, %v568_v55, 0.0  ;;  %v551_v1 = vld [vmem:[%s1721_s14 + $0x78] sm:$0xff] }
  0x23   : > { %583 = vadd.xlane.f32.xlu0 %v582_v17  ;;  %586 = vadd.xlane.f32.xlu1 %v585_v18 }
  0x24   : > { %1457 = vmatmul.mubr.msk.f32.vlgmr.msra.gmra.mrb[0].mxu1 %vm569_vm0, %v537_v25  ;;  %1433 = vmatprep.mubr.msk.f32.mxu0 %vm569_vm0, %v521_v2  ;;  %v618_v2 = vmul.f32 %v1763_v23, %v1763_v23 }
  0x25   : > { %1459 = vmatprep.mubr.msk.f32.mxu1 %vm569_vm0, %v538_v28 }
  0x26   : > { %1434 = vmatmul.mubr.msk.f32.gmra.mrb[2].mxu0 %vm569_vm0, %v1716_v4  ;;  %v619_v4 = vrot.slane %v618_v2, 4 }
  0x27   : > { %592 = vadd.xlane.f32.xlu1 %v591_v29  ;;  %589 = vadd.xlane.f32.xlu0 %v588_v30 }
  0x28   : > { %1460 = vmatmul.mubr.msk.f32.gmra.mrb[2].mxu1 %vm569_vm0, %v539_v33  ;;  %1436 = vmatprep.mubr.msk.f32.mxu0 %vm569_vm0, %v523_v10  ;;  %v620_v6 = vadd.f32 %v619_v4, %v618_v2 }
  0x29   : > { %1462 = vmatprep.mubr.msk.f32.mxu1 %vm569_vm0, %v540_v36 }
  0x2a   : > { %1437 = vmatmul.mubr.msk.f32.gmra.mrb[4].mxu0 %vm569_vm0, %v1733_v12  ;;  %v621_v8 = vrot.slane %v620_v6, 2 }
  0x2b   : > { %598 = vadd.xlane.f32.xlu1 %v597_v37  ;;  %595 = vadd.xlane.f32.xlu0 %v594_v38 }
  0x2c   : > { %1463 = vmatmul.mubr.msk.f32.gmra.mrb[4].mxu1 %vm569_vm0, %v541_v41  ;;  %1439 = vmatprep.mubr.msk.f32.mxu0 %vm569_vm0, %v525_v19  ;;  %v622_v11 = vadd.f32 %v621_v8, %v620_v6 }
  0x2d   : > { %1465 = vmatprep.mubr.msk.f32.mxu1 %vm569_vm0, %v542_v44 }
  0x2e   : > { %1440 = vmatmul.mubr.msk.f32.gmra.mrb[6].mxu0 %vm569_vm0, %v1753_v20  ;;  %v623_v13 = vrot.slane %v622_v11, 1 }
  0x2f   : > { %604 = vadd.xlane.f32.xlu1 %v603_v45  ;;  %601 = vadd.xlane.f32.xlu0 %v600_v46 }
  0x30   : > { %1466 = vmatmul.mubr.msk.f32.gmra.mrb[6].mxu1 %vm569_vm0, %v543_v49  ;;  %1442 = vmatprep.mubr.msk.f32.mxu0 %vm569_vm0, %v527_v26  ;;  %v1835_v16 = vadd.f32 %v623_v13, %v622_v11 }
  0x31   : > { %1468 = vmatprep.mubr.msk.f32.mxu1 %vm569_vm0, %v544_v52 }
  0x32   : > { %1443 = vmatmul.mubr.msk.f32.gmra.mrb[8].mxu0 %vm569_vm0, %v528_v27 }
  0x33   : > { %610 = vadd.xlane.f32.xlu1 %v609_v53  ;;  %607 = vadd.xlane.f32.xlu0 %v606_v54 }
  0x34   : > { %1469 = vmatmul.mubr.msk.f32.gmra.mrb[8].mxu1 %vm569_vm0, %v545_v57  ;;  %1445 = vmatprep.mubr.msk.f32.mxu0 %vm569_vm0, %v529_v34 }
  0x35   : > { %1471 = vmatprep.mubr.msk.f32.mxu1 %vm569_vm0, %v546_v58 }
  0x36   : > { %1446 = vmatmul.mubr.msk.f32.gmra.mrb[10].mxu0 %vm569_vm0, %v530_v35 }
  0x37   : > { %616 = vadd.xlane.f32.xlu1 %v615_v59  ;;  %613 = vadd.xlane.f32.xlu0 %v612_v60 }
  0x38   : > { %1472 = vmatmul.mubr.msk.f32.gmra.mrb[10].mxu1 %vm569_vm0, %v547_v61  ;;  %1448 = vmatprep.mubr.msk.f32.mxu0 %vm569_vm0, %v531_v42 }
  0x39   : > { %1474 = vmatprep.mubr.msk.f32.mxu1 %vm569_vm0, %v548_v62 }
  0x3a   : > { %1449 = vmatmul.mubr.msk.f32.gmra.mrb[12].mxu0 %vm569_vm0, %v532_v43 }
  0x3b   : > { %1451 = vmatprep.mubr.msk.f32.mxu0 %vm569_vm0, %v533_v50 }
  0x3c   : > { %1475 = vmatmul.mubr.msk.f32.gmra.mrb[12].mxu1 %vm569_vm0, %v549_v63 }
  0x3d   : > { %1477 = vmatprep.mubr.msk.f32.mxu1 %vm569_vm0, %v550_v0 }
  0x3e   : > { %1452 = vmatmul.mubr.msk.f32.gmra.mrb[14].mxu0 %vm569_vm0, %v534_v51 }
  0x40   : > { %1478 = vmatmul.mubr.msk.f32.gmra.mrb[14].mxu1 %vm569_vm0, %v551_v1 }
  0xa8   : > { %v578_v3 = vpop.xlane.xlu1 %577  ;;  %v572_v5 = vpop.xlane.xlu0 %571 }
  0xa9   : > { %v818_v25 = vadd.f32 %v1835_v16, %v572_v5  ;;  %v820_v37 = vadd.f32 %v1835_v16, %v578_v3 }
  0xac   : > { %v581_v7 = vpop.xlane.xlu1 %580  ;;  %v575_v9 = vpop.xlane.xlu0 %574 }
  0xad   : > { %v819_v18 = vadd.f32 %v1835_v16, %v575_v9  ;;  %v821_v28 = vadd.f32 %v1835_v16, %v581_v7 }
  0xb0   : > { %v587_v10 = vpop.xlane.xlu1 %586  ;;  %v584_v12 = vpop.xlane.xlu0 %583 }
  0xb1   : > { %v823_v42 = vadd.f32 %v1835_v16, %v587_v10  ;;  %v822_v47 = vadd.f32 %v1835_v16, %v584_v12 }
  0xb4   : > { %v593_v14 = vpop.xlane.xlu1 %592  ;;  %v590_v15 = vpop.xlane.xlu0 %589 }
  0xb5   : > { %v825_v59 = vadd.f32 %v1835_v16, %v593_v14  ;;  %v824_v0 = vadd.f32 %v1835_v16, %v590_v15 }
  0xb8   : > { %v599_v17 = vpop.xlane.xlu1 %598  ;;  %v1838_v19 = vpop.xlane.xlu0 %595 }
  0xb9   : > { %v827_v12 = vadd.f32 %v1835_v16, %v599_v17 }
  0xbc   : > { %v1846_v29 = vpop.xlane.xlu1 %604  ;;  %v602_v43 = vpop.xlane.xlu0 %601 }
  0xbd   : > { %v829_v17 = vadd.f32 %v1835_v16, %v1846_v29 }
  0xc0   : > { %v611_v60 = vpop.xlane.xlu1 %610  ;;  %v608_v13 = vpop.xlane.xlu0 %607 }
  0xc1   : > { %v830_v29 = vadd.f32 %v1835_v16, %v608_v13 }
  0xf5   : > { %v1432_v20 = vpop.f32.mrb[0].mxu0 }
  0xf6   : > { %v835_v22 = vmul.f32 2.0, %v1432_v20  ;;  %v739_v23 = vpop.f32.mrb[1].mxu0  ;;  %v826_v20 = vadd.f32 %v1835_v16, %v1838_v19  ;;  %v617_v19 = vpop.xlane.xlu1 %616 }
  0xf7   : > { %v1840_v21 = vpop.f32.mrb[0].mxu1  ;;  %v834_v26 = vmul.f32 2.0, %v739_v23 }
  0xf8   : > { %v1842_v24 = vpop.f32.mrb[1].mxu1  ;;  %v851_v27 = vsub.f32 %v819_v18, %v835_v22 }
  0xf9   : > { %v850_v30 = vsub.f32 %v818_v25, %v834_v26  ;;  %v1435_v31 = vpop.f32.mrb[2].mxu0 }
  0xfa   : > { %v867_v33 = vmax.f32 %v851_v27, 0.0  ;;  %v837_v34 = vmul.f32 2.0, %v1435_v31  ;;  %v749_v35 = vpop.f32.mrb[3].mxu0 }
  0xfb   : > { %v1848_v32 = vpop.f32.mrb[2].mxu1  ;;  %v866_v38 = vmax.f32 %v850_v30, 0.0  ;;  %v836_v39 = vmul.f32 2.0, %v749_v35 }
  0xfc   : > { %v1850_v36 = vpop.f32.mrb[3].mxu1  ;;  %v883_v40 = vmul.f32 -0.5, %v867_v33  ;;  %v853_v41 = vsub.f32 %v821_v28, %v837_v34 }
  0xfd   : > { %v882_v44 = vmul.f32 -0.5, %v866_v38  ;;  %v852_v45 = vsub.f32 %v820_v37, %v836_v39  ;;  %v1438_v46 = vpop.f32.mrb[4].mxu0  ;;  %v828_v37 = vadd.f32 %v1835_v16, %v602_v43 }
  0xfe   : > { %v900_v49 = vmul.f32 1.442695, %v883_v40  ;;  %v869_v50 = vmax.f32 %v853_v41, 0.0  ;;  %v839_v51 = vmul.f32 2.0, %v1438_v46  ;;  %v759_v52 = vpop.f32.mrb[5].mxu0  ;;  %v831_v41 = vadd.f32 %v1835_v16, %v611_v60 }
  0xff   : > { %v1855_v48 = vpop.f32.mrb[4].mxu1  ;;  %v898_v54 = vmul.f32 1.442695, %v882_v44  ;;  %v868_v55 = vmax.f32 %v852_v45, 0.0  ;;  %v838_v56 = vmul.f32 2.0, %v759_v52 }
 0x100   : > { %v1857_v53 = vpop.f32.mrb[5].mxu1  ;;  %1539 = vpow2.f32 %v900_v49  ;;  %v885_v57 = vmul.f32 -0.5, %v869_v50  ;;  %v855_v58 = vsub.f32 %v823_v42, %v839_v51 }
 0x101   : > { %1541 = vpow2.f32 %v898_v54  ;;  %v884_v61 = vmul.f32 -0.5, %v868_v55  ;;  %v854_v62 = vsub.f32 %v822_v47, %v838_v56  ;;  %v1441_v63 = vpop.f32.mrb[6].mxu0 }
 0x102   : > { %v904_v2 = vmul.f32 1.442695, %v885_v57  ;;  %v871_v3 = vmax.f32 %v855_v58, 0.0  ;;  %v841_v4 = vmul.f32 2.0, %v1441_v63  ;;  %v769_v5 = vpop.f32.mrb[7].mxu0  ;;  %v833_v63 = vadd.f32 %v1835_v16, %v617_v19 }
 0x103   : > { %v1861_v1 = vpop.f32.mrb[6].mxu1  ;;  %v902_v7 = vmul.f32 1.442695, %v884_v61  ;;  %v870_v8 = vmax.f32 %v854_v62, 0.0  ;;  %v840_v9 = vmul.f32 2.0, %v769_v5 }
 0x104   : > { %v1863_v6 = vpop.f32.mrb[7].mxu1  ;;  %1543 = vpow2.f32 %v904_v2  ;;  %v887_v10 = vmul.f32 -0.5, %v871_v3  ;;  %v857_v11 = vsub.f32 %v825_v59, %v841_v4  ;;  %v614_v59 = vpop.xlane.xlu0 %613 }
 0x105   : > { %1545 = vpow2.f32 %v902_v7  ;;  %v886_v14 = vmul.f32 -0.5, %v870_v8  ;;  %v856_v15 = vsub.f32 %v824_v0, %v840_v9  ;;  %v1444_v18 = vpop.f32.mrb[8].mxu0 }
 0x106   : > { %v908_v23 = vmul.f32 1.442695, %v887_v10  ;;  %v873_v25 = vmax.f32 %v857_v11, 0.0  ;;  %v843_v26 = vmul.f32 2.0, %v1444_v18  ;;  %v779_v27 = vpop.f32.mrb[9].mxu0 }
 0x107   : > { %v1868_v22 = vpop.f32.mrb[8].mxu1  ;;  %v906_v30 = vmul.f32 1.442695, %v886_v14  ;;  %v872_v31 = vmax.f32 %v856_v15, 0.0  ;;  %v842_v33 = vmul.f32 2.0, %v779_v27 }
 0x108   : > { %v1870_v28 = vpop.f32.mrb[9].mxu1  ;;  %1547 = vpow2.f32 %v908_v23  ;;  %v889_v34 = vmul.f32 -0.5, %v873_v25  ;;  %v859_v35 = vsub.f32 %v827_v12, %v843_v26  ;;  %v832_v25 = vadd.f32 %v1835_v16, %v614_v59 }
 0x109   : > { %1549 = vpow2.f32 %v906_v30  ;;  %v888_v38 = vmul.f32 -0.5, %v872_v31  ;;  %v858_v39 = vsub.f32 %v826_v20, %v842_v33  ;;  %v1447_v40 = vpop.f32.mrb[10].mxu0 }
 0x10a   : > { %v1540_v44 = vpop.eup %1539  ;;  %v912_v45 = vmul.f32 1.442695, %v889_v34  ;;  %v875_v46 = vmax.f32 %v859_v35, 0.0  ;;  %v845_v47 = vmul.f32 2.0, %v1447_v40  ;;  %v789_v49 = vpop.f32.mrb[11].mxu0 }
 0x10b   : > { %v1876_v42 = vpop.f32.mrb[10].mxu1  ;;  %v1542_v51 = vpop.eup %1541  ;;  %v910_v43 = vmul.f32 1.442695, %v888_v38  ;;  %v874_v52 = vmax.f32 %v858_v39, 0.0  ;;  %v1128_v54 = vmul.f32 %v1540_v44, %v1840_v21  ;;  %v844_v55 = vmul.f32 2.0, %v789_v49 }
 0x10c   : > { %v1879_v50 = vpop.f32.mrb[11].mxu1  ;;  %1551 = vpow2.f32 %v912_v45  ;;  %v891_v56 = vmul.f32 -0.5, %v875_v46  ;;  %v861_v57 = vsub.f32 %v829_v17, %v845_v47  ;;  %v1127_v58 = vmul.f32 %v1542_v51, %v1842_v24 }
 0x10d   : > { %1553 = vpow2.f32 %v910_v43  ;;  %v890_v60 = vmul.f32 -0.5, %v874_v52  ;;  %v860_v61 = vsub.f32 %v828_v37, %v844_v55  ;;  %v1450_v62 = vpop.f32.mrb[12].mxu0 }
 0x10e   : > { %v1544_v2 = vpop.eup %1543  ;;  %v916_v3 = vmul.f32 1.442695, %v891_v56  ;;  %v877_v4 = vmax.f32 %v861_v57, 0.0  ;;  %v1143_v5 = vadd.f32 %v1128_v54, %v1127_v58  ;;  %v847_v21 = vmul.f32 2.0, %v1450_v62  ;;  %v799_v7 = vpop.f32.mrb[13].mxu0 }
 0x10f   : > { %v1884_v0 = vpop.f32.mrb[12].mxu1  ;;  %v1546_v9 = vpop.eup %1545  ;;  %v914_v10 = vmul.f32 1.442695, %v890_v60  ;;  %v876_v24 = vmax.f32 %v860_v61, 0.0  ;;  %v1130_v11 = vmul.f32 %v1544_v2, %v1848_v32  ;;  %v846_v12 = vmul.f32 2.0, %v799_v7 }
 0x110   : > { %v1886_v8 = vpop.f32.mrb[13].mxu1  ;;  %1555 = vpow2.f32 %v916_v3  ;;  %v893_v13 = vmul.f32 -0.5, %v877_v4  ;;  %v863_v14 = vsub.f32 %v831_v41, %v847_v21  ;;  %v1129_v15 = vmul.f32 %v1546_v9, %v1850_v36 }
 0x111   : > { %1557 = vpow2.f32 %v914_v10  ;;  %v892_v18 = vmul.f32 -0.5, %v876_v24  ;;  %v862_v20 = vsub.f32 %v830_v29, %v846_v12  ;;  %v1453_v23 = vpop.f32.mrb[14].mxu0 }
 0x112   : > { %v1548_v27 = vpop.eup %1547  ;;  %v920_v30 = vmul.f32 1.442695, %v893_v13  ;;  %v879_v31 = vmax.f32 %v863_v14, 0.0  ;;  %v1144_v33 = vadd.f32 %v1143_v5, %v1129_v15  ;;  %v849_v17 = vmul.f32 2.0, %v1453_v23  ;;  %v809_v34 = vpop.f32.mrb[15].mxu0 }
 0x113   : > { %v1479_v26 = vpop.f32.mrb[14].mxu1  ;;  %v1550_v35 = vpop.eup %1549  ;;  %v918_v37 = vmul.f32 1.442695, %v892_v18  ;;  %v878_v19 = vmax.f32 %v862_v20, 0.0  ;;  %v1132_v38 = vmul.f32 %v1548_v27, %v1855_v48  ;;  %v848_v36 = vmul.f32 2.0, %v809_v34 }
 0x114   : > { %v1114_v32 = vpop.f32.mrb[15].mxu1  ;;  %1559 = vpow2.f32 %v920_v30  ;;  %v895_v39 = vmul.f32 -0.5, %v879_v31  ;;  %v865_v40 = vsub.f32 %v833_v63, %v849_v17  ;;  %v1131_v41 = vmul.f32 %v1550_v35, %v1857_v53 }
 0x115   : > { %1561 = vpow2.f32 %v918_v37  ;;  %v894_v16 = vmul.f32 -0.5, %v878_v19  ;;  %v1145_v44 = vadd.f32 %v1144_v33, %v1130_v11  ;;  %v864_v45 = vsub.f32 %v832_v25, %v848_v36 }
 0x116   : > { %v1552_v46 = vpop.eup %1551  ;;  %v924_v47 = vmul.f32 1.442695, %v895_v39  ;;  %v881_v49 = vmax.f32 %v865_v40, 0.0  ;;  %v1627_v31 = vmov (!%p1390_p1), 0.0  }
 0x117   : > { %v1554_v29 = vpop.eup %1553  ;;  %v922_v51 = vmul.f32 1.442695, %v894_v16  ;;  %v1146_v43 = vadd.f32 %v1145_v44, %v1131_v41  ;;  %v880_v52 = vmax.f32 %v864_v45, 0.0  ;;  %v1134_v54 = vmul.f32 %v1552_v46, %v1861_v1  ;;  %1172 = vst.msk [vmem:[#allocation2] sm:$0x1] (!%p1390_p1), %vm1171_vm1, %v1627_v31 }
 0x118   : > { %1563 = vpow2.f32 %v924_v47  ;;  %v897_v48 = vmul.f32 -0.5, %v881_v49  ;;  %v1133_v55 = vmul.f32 %v1554_v29, %v1863_v6 }
 0x119   : > { %1565 = vpow2.f32 %v922_v51  ;;  %v896_v56 = vmul.f32 -0.5, %v880_v52  ;;  %v1147_v53 = vadd.f32 %v1146_v43, %v1132_v38 }
 0x11a   : > { %v1556_v57 = vpop.eup %1555  ;;  %v928_v58 = vmul.f32 1.442695, %v897_v48 }
 0x11b   : > { %v1558_v59 = vpop.eup %1557  ;;  %v926_v60 = vmul.f32 1.442695, %v896_v56  ;;  %v1148_v61 = vadd.f32 %v1147_v53, %v1133_v55  ;;  %v1136_v62 = vmul.f32 %v1556_v57, %v1868_v22 }
 0x11c   : > { %1567 = vpow2.f32 %v928_v58  ;;  %v1135_v63 = vmul.f32 %v1558_v59, %v1870_v28 }
 0x11d   : > { %1569 = vpow2.f32 %v926_v60  ;;  %v1149_v2 = vadd.f32 %v1148_v61, %v1134_v54 }
 0x11e   : > { %v1560_v1 = vpop.eup %1559 }
 0x11f   : > { %v1562_v3 = vpop.eup %1561  ;;  %v1150_v4 = vadd.f32 %v1149_v2, %v1135_v63  ;;  %v1138_v6 = vmul.f32 %v1560_v1, %v1876_v42 }
 0x120   : > { %v1137_v5 = vmul.f32 %v1562_v3, %v1879_v50 }
 0x121   : > { %v1151_v21 = vadd.f32 %v1150_v4, %v1136_v62 }
 0x122   : > { %v1564_v7 = vpop.eup %1563 }
 0x123   : > { %v1566_v9 = vpop.eup %1565  ;;  %v1152_v10 = vadd.f32 %v1151_v21, %v1137_v5  ;;  %v1140_v22 = vmul.f32 %v1564_v7, %v1884_v0 }
 0x124   : > { %v1139_v24 = vmul.f32 %v1566_v9, %v1886_v8 }
 0x125   : > { %v1153_v28 = vadd.f32 %v1152_v10, %v1138_v6 }
 0x126   : > { %v1568_v11 = vpop.eup %1567 }
 0x127   : > { %v1570_v12 = vpop.eup %1569  ;;  %v1154_v13 = vadd.f32 %v1153_v28, %v1139_v24  ;;  %v1142_v14 = vmul.f32 %v1568_v11, %v1479_v26 }
 0x128   : > { %v1141_v15 = vmul.f32 %v1570_v12, %v1114_v32 }
 0x129   : > { %v1155_v18 = vadd.f32 %v1154_v13, %v1140_v22 }
 0x12b   : > { %v1156_v42 = vadd.f32 %v1155_v18, %v1141_v15 }
 0x12d   : > { %v1157_v20 = vadd.f32 %v1156_v42, %v1142_v14 }
 0x12f   : > { %1158 = vadd.xlane.f32.xlu0 %v1157_v20 }
 0x1bc   : > { %v1159_v50 = vpop.xlane.xlu0 %1158 }
 0x1bd   : > { %v1160_v0 = vrot.slane %v1159_v50, 4 }
 0x1bf   : > { %v1161_v8 = vadd.f32 %v1160_v0, %v1159_v50 }
 0x1c1   : > { %v1162_v23 = vrot.slane %v1161_v8, 2 }
 0x1c3   : > { %v1163_v25 = vadd.f32 %v1162_v23, %v1161_v8 }
 0x1c5   : > { %v1164_v26 = vrot.slane %v1163_v25, 1 }
 0x1c7   : > { %v1165_v27 = vadd.f32 %v1164_v26, %v1163_v25 }
 0x1c9   : > { %1480 = vpush %v1165_v27 }
 0x1f5   : > { %1170 = sbr.rel (%p1390_p1) target bundleno = 508 (0x1fc), region = 40 }
 0x1fa   : > { %s1481_s12 = spop %1480 }
 0x1fb   : > { %v1167_v30 = vstv %s1481_s12 }
 0x1fc PF: > { %v1173_v33 = vld [vmem:[#allocation2] sm:$0x1]  ;;  %v1174_v17 = vstv %s1126_s11  ;;  %vm1177_vm2 = vcmask 0   ;;  %p1391_p2 = scmp.ne.s32.totalorder %s1601_s15, 1 }
 0x1fd   : > { %v1175_v34 = vmul.f32 %v1174_v17, %v1167_v30 }
 0x1fe   : > { %1181 = sbr.rel (%p1391_p2) target bundleno = 522 (0x20a), region = 44 }
 0x1ff   : > { %v1176_v32 = vadd.f32 %v1175_v34, %v1173_v33 }
 0x201   : > { %1178 = vst.msk [vmem:[#allocation2] sm:$0x1] %vm1177_vm2, %v1176_v32 }
 0x208   : > { %v1182_v35 = vld [vmem:[#allocation2] sm:$0x1] }
 0x209   : > { %1183 = vst.msk [vmem:[%s518_s29] sm:$0x1] %vm1177_vm2, %v1182_v35 }
 0x20a PF: > { %s14_s21 = sadd.s32 1, %s1625_s21   ;;  %s1943_s15 = smov %s1613_s18 }
 0x20b   : > { %p11_p3 = scmp.ge.s32.totalorder %s14_s21, 10   ;;  %s1944_s16 = smov %s1617_s19 }
 0x20c   : > { %s1945_s17 = smov %s1621_s20  ;;  %s1946_s18 = smov %s1950_s22 }
 0x20d   : > { %s1947_s19 = smov %s1954_s23  ;;  %s1948_s20 = smov %s1958_s24 }
 0x20e   :  { %13 = sbr.rel (!%p11_p3) target bundleno = 4 (0x4), region = 83 }

</bundles_post_ra>
